<compile_context>
chip_gen: v7x
topology: tpu7x:2x2x1
jax: 0.10.0
libtpu: 0.0.40
codegen_flags: <defaults>
</compile_context>

<pallas_src>
import functools
import math

import jax
import jax.numpy as jnp
from jax.experimental import pallas as pl
from jax.experimental.pallas import tpu as pltpu


def _round_up(x, m):
    return (x + m - 1) // m * m


def _pen_tanh(v):
    # PenalizedTanh: tanh(v) if v > 0 else 0.25 * tanh(v)
    a = jnp.tanh(v)
    return jnp.where(v > 0, a, 0.25 * a)


def gru_pentanh_kernel(x_ref, hfull_ref, hblk_ref, wx_ref, wh_ref,
                       b0_ref, bhn_ref, hy_ref):
    # x_ref    : (TM, In_p)          hfull_ref: (TM, H_p)   (contraction copy)
    # hblk_ref : (TM, hn)            (blend copy for this H sub-block)
    # wx_ref   : (In_p, 3*hn)        wh_ref   : (H_p, 3*hn)
    # b0_ref   : (1, 3*hn)  r/i lanes = bx+bh (folded), n lanes = bx only
    # bhn_ref  : (1, hn)    bh for the n gate
    # hy_ref   : (TM, hn)
    hn = hy_ref.shape[-1]
    cdt = wx_ref.dtype  # matmul compute dtype (f32 or bf16 weights)

    # Two lane-dense MXU pushes (N = 3*hn), f32 accumulation.
    gx = jnp.dot(x_ref[...].astype(cdt), wx_ref[...],
                 preferred_element_type=jnp.float32)
    gh = jnp.dot(hfull_ref[...].astype(cdt), wh_ref[...],
                 preferred_element_type=jnp.float32)
    gx = gx + b0_ref[...]  # single broadcast bias add (f32)

    # Static 128-aligned lane slices -> (r, i, n) gates of this H sub-block.
    resetgate = _pen_tanh(gx[:, :hn] + gh[:, :hn])
    inputgate = _pen_tanh(gx[:, hn:2 * hn] + gh[:, hn:2 * hn])
    h_n = gh[:, 2 * hn:] + bhn_ref[...]
    newgate = _pen_tanh(gx[:, 2 * hn:] + resetgate * h_n)

    hf = hblk_ref[...].astype(jnp.float32)
    hy = newgate + inputgate * (hf - newgate)
    hy_ref[...] = hy.astype(hy_ref.dtype)


def pack_params(w_x2h, b_x2h, w_h2h, b_h2h, *, weight_dtype=None, hn_max=512):
    """Convert PyTorch-layout Linear params to the fused/padded kernel layout.

    w_x2h: (3H, In), b_x2h: (3H,), w_h2h: (3H, H), b_h2h: (3H,)
    Returns:
      wx_all (In_p, n_blk*3*hn), wh_all (H_p, n_blk*3*hn),
      b0_all (1, n_blk*3*hn), bhn_all (1, H_p), hn
    where H_p = n_blk*hn (hn a multiple of 128), In_p is padded only to
    sublane granularity, and H sub-block j holds its (r, i, n) gate columns
    contiguously in lanes [j*3*hn, (j+1)*3*hn).
    """
    three_h, in_size = w_x2h.shape
    hidden_size = three_h // 3
    if weight_dtype is None:
        weight_dtype = w_x2h.dtype
    w_isz = jnp.dtype(weight_dtype).itemsize
    sub = 8 * (4 // w_isz)                       # 8 for f32, 16 for bf16
    inp = _round_up(in_size, sub)

    hp128 = _round_up(hidden_size, 128)
    if hp128 <= hn_max:
        hn, n_blk = hp128, 1
    else:
        n_blk = pl.cdiv(hp128, hn_max)
        hn = _round_up(pl.cdiv(hp128, n_blk), 128)
    hp = hn * n_blk

    def fuse_w(w, k, kp):
        # w: (3H, k) PyTorch Linear layout; gate g rows are [g*H, (g+1)*H).
        out = jnp.zeros((kp, n_blk * 3 * hn), dtype=weight_dtype)
        for j in range(n_blk):
            lo = j * hn
            width = min(hn, hidden_size - lo)
            if width <= 0:
                break
            for g in range(3):
                blk = w[g * hidden_size + lo: g * hidden_size + lo + width, :].T
                col = j * 3 * hn + g * hn
                out = out.at[:k, col:col + width].set(blk.astype(weight_dtype))
        return out

    wx_all = fuse_w(w_x2h, in_size, inp)
    wh_all = fuse_w(w_h2h, hidden_size, hp)

    bx3 = b_x2h.reshape(3, hidden_size).astype(jnp.float32)
    bh3 = b_h2h.reshape(3, hidden_size).astype(jnp.float32)
    b0 = jnp.zeros((1, n_blk * 3 * hn), jnp.float32)
    bhn = jnp.zeros((1, hp), jnp.float32)
    for j in range(n_blk):
        lo = j * hn
        width = min(hn, hidden_size - lo)
        if width <= 0:
            break
        base = j * 3 * hn
        # r and i biases folded (only ever used as i_* + h_*).
        b0 = b0.at[0, base:base + width].set(bx3[0, lo:lo + width] + bh3[0, lo:lo + width])
        b0 = b0.at[0, base + hn:base + hn + width].set(bx3[1, lo:lo + width] + bh3[1, lo:lo + width])
        # n gate needs bx_n and bh_n separately.
        b0 = b0.at[0, base + 2 * hn:base + 2 * hn + width].set(bx3[2, lo:lo + width])
        bhn = bhn.at[0, lo:lo + width].set(bh3[2, lo:lo + width])

    return wx_all, wh_all, b0, bhn, hn


@functools.partial(jax.jit, static_argnames=("hn", "block_b"))
def gru_pentanh_cell(x, hidden, wx_all, wh_all, b0_all, bhn_all, *, hn,
                     block_b=None):
    """One GRUPenTanhCell step.

    x: (B, input_size)  hidden: (B, hidden_size)
    wx_all/wh_all/b0_all/bhn_all/hn: fused padded params from pack_params().
    """
    B, input_size = x.shape
    _, hidden_size = hidden.shape
    inp = wx_all.shape[0]
    hp = wh_all.shape[0]
    n_blk = hp // hn

    # Per-core VMEM budget (v5e/v6e: 128 MiB, v7x: 64 MiB).
    try:
        vmem_cap = int(pltpu.get_tpu_info().vmem_capacity_bytes)
    except Exception:  # pragma: no cover - conservative fallback
        vmem_cap = 64 << 20

    if block_b is None:
        block_b = 512 if vmem_cap >= (100 << 20) else 256

    # Balanced batch tiles (minimize padding), >=2 grid steps when possible so
    # a 2-TensorCore chip (v7x) can split the work.
    bp8 = _round_up(max(B, 8), 8)
    n_bt = pl.cdiv(bp8, block_b)
    tm = _round_up(pl.cdiv(bp8, n_bt), 8)
    if n_bt * n_blk == 1 and bp8 >= 16:
        n_bt = 2
        tm = _round_up(pl.cdiv(bp8, 2), 8)
    bp = tm * n_bt

    x_p = x if (bp == B and inp == input_size) else (
        jnp.zeros((bp, inp), x.dtype).at[:B, :input_size].set(x))
    h_p = hidden if (bp == B and hp == hidden_size) else (
        jnp.zeros((bp, hp), hidden.dtype).at[:B, :hidden_size].set(hidden))

    w_isz = jnp.dtype(wx_all.dtype).itemsize
    o_isz = jnp.dtype(hidden.dtype).itemsize
    wbufs = 1 if n_blk == 1 else 2          # single-buffer resident weights
    weight_bytes = wbufs * ((inp + hp) * 3 * hn * w_isz + 4 * hn * 4)
    act_bytes = 2 * tm * (inp * x_p.dtype.itemsize
                          + (hp + hn) * h_p.dtype.itemsize + hn * o_isz)
    live_bytes = 6 * tm * 3 * hn * 4        # gx/gh/gate f32 temporaries (rough)
    vmem_limit = int(min(max(weight_bytes + act_bytes + live_bytes + (4 << 20),
                             32 << 20),
                         vmem_cap - (8 << 20)))

    flops = 2 * bp * (inp + hp) * 3 * hp
    transcendentals = 3 * bp * hp
    bytes_accessed = (x_p.size * x_p.dtype.itemsize + h_p.size * h_p.dtype.itemsize
                      + (wx_all.size + wh_all.size) * w_isz
                      + (b0_all.size + bhn_all.size) * 4 + bp * hp * o_isz)

    resident = pl.Buffered(1) if n_blk == 1 else None

    def spec(shape, imap, mode=None):
        if mode is None:
            return pl.BlockSpec(shape, imap)
        return pl.BlockSpec(shape, imap, pipeline_mode=mode)

    out = pl.pallas_call(
        gru_pentanh_kernel,
        out_shape=jax.ShapeDtypeStruct((bp, hp), hidden.dtype),
        grid=(n_bt, n_blk),
        in_specs=[
            pl.BlockSpec((tm, inp), lambda i, j: (i, 0)),       # x (batch tile)
            pl.BlockSpec((tm, hp), lambda i, j: (i, 0)),        # h, contraction copy
            pl.BlockSpec((tm, hn), lambda i, j: (i, j)),        # h, blend copy
            spec((inp, 3 * hn), lambda i, j: (0, j), resident),  # wx tile
            spec((hp, 3 * hn), lambda i, j: (0, j), resident),   # wh tile
            spec((1, 3 * hn), lambda i, j: (0, j), resident),    # folded bias
            spec((1, hn), lambda i, j: (0, j), resident),        # bh_n
        ],
        out_specs=pl.BlockSpec((tm, hn), lambda i, j: (i, j)),
        compiler_params=pltpu.CompilerParams(
            dimension_semantics=("parallel", "parallel"),
            vmem_limit_bytes=vmem_limit,
        ),
        cost_estimate=pl.CostEstimate(
            flops=flops,
            transcendentals=transcendentals,
            bytes_accessed=bytes_accessed,
        ),
    )(x_p, h_p, h_p, wx_all, wh_all, b0_all, bhn_all)

    return out[:B, :hidden_size]


def reference_forward(x, hidden, w_x2h, b_x2h, w_h2h, b_h2h):
    """Plain-JAX reference mirroring the PyTorch forward (PyTorch weight layout)."""
    H = hidden.shape[1]
    gate_x = x @ w_x2h.T + b_x2h
    gate_h = hidden @ w_h2h.T + b_h2h
    i_r, i_i, i_n = gate_x[:, :H], gate_x[:, H:2 * H], gate_x[:, 2 * H:]
    h_r, h_i, h_n = gate_h[:, :H], gate_h[:, H:2 * H], gate_h[:, 2 * H:]

    def pen_tanh(v):
        a = jnp.tanh(v)
        return jnp.where(v > 0, a, 0.25 * a)

    resetgate = pen_tanh(i_r + h_r)
    inputgate = pen_tanh(i_i + h_i)
    newgate = pen_tanh(i_n + resetgate * h_n)
    return newgate + inputgate * (hidden - newgate)


if __name__ == "__main__":
    B, INPUT_SIZE, HIDDEN_SIZE = 8, 16, 32

    key = jax.random.PRNGKey(0)
    k1, k2, k3, k4, kx, kh = jax.random.split(key, 6)

    # reset_parameters(): U(-std, std), std = 1/sqrt(H), PyTorch Linear layout.
    std = 1.0 / math.sqrt(HIDDEN_SIZE)
    w_x2h = jax.random.uniform(k1, (3 * HIDDEN_SIZE, INPUT_SIZE), jnp.float32, -std, std)
    b_x2h = jax.random.uniform(k2, (3 * HIDDEN_SIZE,), jnp.float32, -std, std)
    w_h2h = jax.random.uniform(k3, (3 * HIDDEN_SIZE, HIDDEN_SIZE), jnp.float32, -std, std)
    b_h2h = jax.random.uniform(k4, (3 * HIDDEN_SIZE,), jnp.float32, -std, std)

    x = jax.random.normal(kx, (B, INPUT_SIZE), jnp.float32)
    hidden = jax.random.normal(kh, (B, HIDDEN_SIZE), jnp.float32)

    hy_ref = reference_forward(x, hidden, w_x2h, b_x2h, w_h2h, b_h2h)

    # f32 weights: tight numerical check.
    wx, wh, b0, bhn, hn = pack_params(w_x2h, b_x2h, w_h2h, b_h2h,
                                      weight_dtype=jnp.float32)
    hy = jax.block_until_ready(gru_pentanh_cell(x, hidden, wx, wh, b0, bhn, hn=hn))
    assert hy.shape == (B, HIDDEN_SIZE)
    assert jnp.allclose(hy, hy_ref, atol=1e-5, rtol=1e-5), "f32 mismatch vs reference"

    # bf16 weights (recommended on all generations incl. v5e): looser tolerance.
    wxb, whb, b0b, bhnb, hnb = pack_params(w_x2h, b_x2h, w_h2h, b_h2h,
                                           weight_dtype=jnp.bfloat16)
    hy_bf16 = jax.block_until_ready(
        gru_pentanh_cell(x, hidden, wxb, whb, b0b, bhnb, hn=hnb))
    assert hy_bf16.shape == (B, HIDDEN_SIZE)
    assert jnp.allclose(hy_bf16, hy_ref, atol=5e-2, rtol=5e-2), "bf16 mismatch vs reference"

    print("KERNEL_OK")
</pallas_src>

<mosaic_0001>
module attributes {stable_mosaic.version = 11 : i64} {
  func.func @gru_pentanh_kernel(%arg0: i32, %arg1: i32, %arg2: memref<8x16xf32, #tpu.memory_space<vmem>>, %arg3: memref<8x128xf32, #tpu.memory_space<vmem>>, %arg4: memref<8x128xf32, #tpu.memory_space<vmem>>, %arg5: memref<16x384xf32, #tpu.memory_space<vmem>>, %arg6: memref<128x384xf32, #tpu.memory_space<vmem>>, %arg7: memref<1x384xf32, #tpu.memory_space<vmem>>, %arg8: memref<1x128xf32, #tpu.memory_space<vmem>>, %arg9: memref<8x128xf32, #tpu.memory_space<vmem>>) attributes {dimension_semantics = [#tpu.dimension_semantics<parallel>, #tpu.dimension_semantics<parallel>], iteration_bounds = array<i64: 1, 1>, scalar_prefetch = 0 : i64, scratch_operands = 0 : i64, tpu.core_type = #tpu.core_type<tc>, window_params = [{transform_indices = @transform_0, window_bounds = array<i64: 8, 16>}, {transform_indices = @transform_1, window_bounds = array<i64: 8, 128>}, {transform_indices = @transform_2, window_bounds = array<i64: 8, 128>}, {pipeline_mode = #tpu.pipeline_mode<synchronous>, transform_indices = @transform_3, window_bounds = array<i64: 16, 384>}, {pipeline_mode = #tpu.pipeline_mode<synchronous>, transform_indices = @transform_4, window_bounds = array<i64: 128, 384>}, {pipeline_mode = #tpu.pipeline_mode<synchronous>, transform_indices = @transform_5, window_bounds = array<i64: 1, 384>}, {pipeline_mode = #tpu.pipeline_mode<synchronous>, transform_indices = @transform_6, window_bounds = array<i64: 1, 128>}, {transform_indices = @transform_7, window_bounds = array<i64: 8, 128>}]} {
    %c0 = arith.constant 0 : index
    %c0_0 = arith.constant 0 : index
    %0 = vector.load %arg2[%c0, %c0_0] : memref<8x16xf32, #tpu.memory_space<vmem>>, vector<8x16xf32>
    %c0_1 = arith.constant 0 : index
    %c0_2 = arith.constant 0 : index
    %1 = vector.load %arg5[%c0_1, %c0_2] : memref<16x384xf32, #tpu.memory_space<vmem>>, vector<16x384xf32>
    %cst = arith.constant dense<0.000000e+00> : vector<8x384xf32>
    %2 = tpu.matmul %0, %1, %cst {dimension_numbers = #tpu.dot_dimension_numbers<[1], [0], [0], [1], [0, 0, 1, 1], [], []>} : vector<8x16xf32>, vector<16x384xf32>, vector<8x384xf32> -> vector<8x384xf32>
    %c0_3 = arith.constant 0 : index
    %c0_4 = arith.constant 0 : index
    %3 = vector.load %arg3[%c0_3, %c0_4] : memref<8x128xf32, #tpu.memory_space<vmem>>, vector<8x128xf32>
    %c0_5 = arith.constant 0 : index
    %c0_6 = arith.constant 0 : index
    %4 = vector.load %arg6[%c0_5, %c0_6] : memref<128x384xf32, #tpu.memory_space<vmem>>, vector<128x384xf32>
    %cst_7 = arith.constant dense<0.000000e+00> : vector<8x384xf32>
    %5 = tpu.matmul %3, %4, %cst_7 {dimension_numbers = #tpu.dot_dimension_numbers<[1], [0], [0], [1], [0, 0, 1, 1], [], []>} : vector<8x128xf32>, vector<128x384xf32>, vector<8x384xf32> -> vector<8x384xf32>
    %c0_8 = arith.constant 0 : index
    %c0_9 = arith.constant 0 : index
    %6 = vector.load %arg7[%c0_8, %c0_9] : memref<1x384xf32, #tpu.memory_space<vmem>>, vector<1x384xf32>
    %7 = vector.broadcast %6 : vector<1x384xf32> to vector<8x384xf32>
    %8 = arith.addf %2, %7 : vector<8x384xf32>
    %9 = vector.extract_strided_slice %8 {offsets = [0, 0], sizes = [8, 128], strides = [1, 1]} : vector<8x384xf32> to vector<8x128xf32>
    %10 = vector.extract_strided_slice %5 {offsets = [0, 0], sizes = [8, 128], strides = [1, 1]} : vector<8x384xf32> to vector<8x128xf32>
    %11 = arith.addf %9, %10 : vector<8x128xf32>
    %12 = math.tanh %11 : vector<8x128xf32>
    %cst_10 = arith.constant 0.000000e+00 : f32
    %13 = vector.broadcast %cst_10 : f32 to vector<8x128xf32>
    %14 = arith.cmpf ogt, %11, %13 : vector<8x128xf32>
    %cst_11 = arith.constant 2.500000e-01 : f32
    %15 = vector.broadcast %cst_11 : f32 to vector<8x128xf32>
    %16 = arith.mulf %15, %12 : vector<8x128xf32>
    %17 = arith.select %14, %12, %16 : vector<8x128xi1>, vector<8x128xf32>
    %18 = vector.extract_strided_slice %8 {offsets = [0, 128], sizes = [8, 128], strides = [1, 1]} : vector<8x384xf32> to vector<8x128xf32>
    %19 = vector.extract_strided_slice %5 {offsets = [0, 128], sizes = [8, 128], strides = [1, 1]} : vector<8x384xf32> to vector<8x128xf32>
    %20 = arith.addf %18, %19 : vector<8x128xf32>
    %21 = math.tanh %20 : vector<8x128xf32>
    %cst_12 = arith.constant 0.000000e+00 : f32
    %22 = vector.broadcast %cst_12 : f32 to vector<8x128xf32>
    %23 = arith.cmpf ogt, %20, %22 : vector<8x128xf32>
    %cst_13 = arith.constant 2.500000e-01 : f32
    %24 = vector.broadcast %cst_13 : f32 to vector<8x128xf32>
    %25 = arith.mulf %24, %21 : vector<8x128xf32>
    %26 = arith.select %23, %21, %25 : vector<8x128xi1>, vector<8x128xf32>
    %27 = vector.extract_strided_slice %5 {offsets = [0, 256], sizes = [8, 128], strides = [1, 1]} : vector<8x384xf32> to vector<8x128xf32>
    %c0_14 = arith.constant 0 : index
    %c0_15 = arith.constant 0 : index
    %28 = vector.load %arg8[%c0_14, %c0_15] : memref<1x128xf32, #tpu.memory_space<vmem>>, vector<1x128xf32>
    %29 = vector.broadcast %28 : vector<1x128xf32> to vector<8x128xf32>
    %30 = arith.addf %27, %29 : vector<8x128xf32>
    %31 = vector.extract_strided_slice %8 {offsets = [0, 256], sizes = [8, 128], strides = [1, 1]} : vector<8x384xf32> to vector<8x128xf32>
    %32 = arith.mulf %17, %30 : vector<8x128xf32>
    %33 = arith.addf %31, %32 : vector<8x128xf32>
    %34 = math.tanh %33 : vector<8x128xf32>
    %cst_16 = arith.constant 0.000000e+00 : f32
    %35 = vector.broadcast %cst_16 : f32 to vector<8x128xf32>
    %36 = arith.cmpf ogt, %33, %35 : vector<8x128xf32>
    %cst_17 = arith.constant 2.500000e-01 : f32
    %37 = vector.broadcast %cst_17 : f32 to vector<8x128xf32>
    %38 = arith.mulf %37, %34 : vector<8x128xf32>
    %39 = arith.select %36, %34, %38 : vector<8x128xi1>, vector<8x128xf32>
    %c0_18 = arith.constant 0 : index
    %c0_19 = arith.constant 0 : index
    %40 = vector.load %arg4[%c0_18, %c0_19] : memref<8x128xf32, #tpu.memory_space<vmem>>, vector<8x128xf32>
    %41 = arith.subf %40, %39 : vector<8x128xf32>
    %42 = arith.mulf %26, %41 : vector<8x128xf32>
    %43 = arith.addf %39, %42 : vector<8x128xf32>
    %c0_20 = arith.constant 0 : index
    %c0_21 = arith.constant 0 : index
    %44 = vector.load %arg9[%c0_20, %c0_21] : memref<8x128xf32, #tpu.memory_space<vmem>>, vector<8x128xf32>
    tpu.vector_store %arg9[%c0_20, %c0_21], %43 {strides = array<i32>} : memref<8x128xf32, #tpu.memory_space<vmem>>, vector<8x128xf32>,
    return
  }
  func.func @transform_0(%arg0: i32, %arg1: i32) -> (i32, i32) {
    %c0_i32 = arith.constant 0 : i32
    %c0_i32_0 = arith.constant 0 : i32
    return %arg0, %c0_i32 : i32, i32
  }
  func.func @transform_1(%arg0: i32, %arg1: i32) -> (i32, i32) {
    %c0_i32 = arith.constant 0 : i32
    %c0_i32_0 = arith.constant 0 : i32
    return %arg0, %c0_i32 : i32, i32
  }
  func.func @transform_2(%arg0: i32, %arg1: i32) -> (i32, i32) {
    %c0_i32 = arith.constant 0 : i32
    return %arg0, %arg1 : i32, i32
  }
  func.func @transform_3(%arg0: i32, %arg1: i32) -> (i32, i32) {
    %c0_i32 = arith.constant 0 : i32
    %c0_i32_0 = arith.constant 0 : i32
    return %c0_i32, %arg1 : i32, i32
  }
  func.func @transform_4(%arg0: i32, %arg1: i32) -> (i32, i32) {
    %c0_i32 = arith.constant 0 : i32
    %c0_i32_0 = arith.constant 0 : i32
    return %c0_i32, %arg1 : i32, i32
  }
  func.func @transform_5(%arg0: i32, %arg1: i32) -> (i32, i32) {
    %c0_i32 = arith.constant 0 : i32
    %c0_i32_0 = arith.constant 0 : i32
    return %c0_i32, %arg1 : i32, i32
  }
  func.func @transform_6(%arg0: i32, %arg1: i32) -> (i32, i32) {
    %c0_i32 = arith.constant 0 : i32
    %c0_i32_0 = arith.constant 0 : i32
    return %c0_i32, %arg1 : i32, i32
  }
  func.func @transform_7(%arg0: i32, %arg1: i32) -> (i32, i32) {
    %c0_i32 = arith.constant 0 : i32
    return %arg0, %arg1 : i32, i32
  }
}

</mosaic_0001>

<bundles_post_ra>
// kernel: gru_pentanh_cell.1
= control target key start
LH: loop header
LB: loop body
LE: loop exit
PB: predicated region body
PF: predicated region fallthrough
CT: control target
= control target key end

     0   :  { %12 = vsyncpa [#allocation3], 0  ;;  %s791_s0 = inlined_call_operand.vmem [shape: f32[8,16], index: 0, kind: input, shape index: {}]   ;;  %s792_s1 = inlined_call_operand.vmem [shape: f32[8,128], index: 1, kind: input, shape index: {}, may-alias: {1,2}]   ;;  %s793_s2 = inlined_call_operand.vmem [shape: f32[8,128], index: 2, kind: input, shape index: {}, may-alias: {1,2}]   ;;  %s794_s3 = inlined_call_operand.hbm [shape: f32[16,384], index: 3, kind: input, shape index: {}]   ;;  %s795_s4 = inlined_call_operand.hbm [shape: f32[128,384], index: 4, kind: input, shape index: {}]   ;;  %s796_s5 = inlined_call_operand.vmem [shape: f32[1,384], index: 5, kind: input, shape index: {}]   ;;  %s797_s6 = inlined_call_operand.vmem [shape: f32[1,128], index: 6, kind: input, shape index: {}]   ;;  %s798_s7 = inlined_call_operand.hbm [shape: f32[8,128], index: 7, kind: output, shape index: {}]  }
   0x1   :  { %13 = vsyncpa [#allocation6], 0 }
   0x2   :  { %14 = vsyncpa [#allocation4], 0  ;;  %s677_s24 = smov [#allocation2]   ;;  %s605_s28 = scalar_lea.hbm %s794_s3, 768 }
   0x3   :  { %s26_s25 = sshll.u32 %s677_s24, 4  ;;  %p606_p0 = scmp.ne.s32.totalorder %s794_s3, %s605_s28  ;;  %s27_s25 = int_to_ptr.vmem [resolvable:$true] %s26_s25 }
   0x4   :  { %p609_p1 = scmp.lt.u32.totalorder %s605_s28, %s794_s3 }
   0x6   :  { %p611_p2 = pnand %p609_p1, %p606_p0 }
   0x8   :  { %614 = shalt.err (!%p611_p2)
}
   0x9   :  { %s615_s10 = scalar_lea.vmem %s27_s25, 768  ;;  %p620_p4 = scmp.lt.s32.totalorder %s27_s25, %s27_s25 }
   0xa   :  { %p616_p3 = scmp.ne.s32.totalorder %s27_s25, %s615_s10  ;;  %p621_p5 = scmp.lt.s32.totalorder %s615_s10, %s615_s10 }
   0xc   :  { %p622_p6 = por %p621_p5, %p620_p4 }
   0xe   :  { %p623_p7 = pnand %p622_p6, %p616_p3 }
  0x10   :  { %626 = shalt.err (!%p623_p7)
}
  0x11   :  { %s678_s11 = smov 384   ;;  %s679_s12 = smov 24  }
  0x12   :  { %32 = dma.hbm_to_vmem [thread:$0]  %s794_s3, 768, %s27_s25, [#allocation3], %s678_s11, %s678_s11, %s679_s12  }
  0x13   :  { %s680_s15 = smov [#allocation5]   ;;  %s627_s19 = scalar_lea.hbm %s795_s4, 6144 }
  0x14   :  { %s38_s16 = sshll.u32 %s680_s15, 4  ;;  %p628_p8 = scmp.ne.s32.totalorder %s795_s4, %s627_s19  ;;  %s39_s16 = int_to_ptr.vmem [resolvable:$true] %s38_s16 }
  0x15   :  { %p631_p9 = scmp.lt.u32.totalorder %s627_s19, %s795_s4 }
  0x17   :  { %p633_p10 = pnand %p631_p9, %p628_p8 }
  0x19   :  { %636 = shalt.err (!%p633_p10)
}
  0x1a   :  { %s637_s24 = scalar_lea.vmem %s39_s16, 6144  ;;  %p642_p12 = scmp.lt.s32.totalorder %s39_s16, %s39_s16 }
  0x1b   :  { %p638_p11 = scmp.ne.s32.totalorder %s39_s16, %s637_s24  ;;  %p643_p13 = scmp.lt.s32.totalorder %s637_s24, %s637_s24 }
  0x1d   :  { %p644_p0 = por %p643_p13, %p642_p12 }
  0x1f   :  { %p645_p1 = pnand %p644_p0, %p638_p11 }
  0x21   :  { %648 = shalt.err (!%p645_p1)
}
  0x22   :  { %44 = dma.hbm_to_vmem [thread:$0]  %s795_s4, 6144, %s39_s16, [#allocation6], %s678_s11, %s678_s11, %s679_s12  }
  0x23   :  { %671 = dma.done.wait [#allocation3], 768  }
  0x24   :  { %672 = vsyncadd [#allocation3], 4294966528 }
  0x25   :  { %673 = dma.done.wait [#allocation6], 6144  }
  0x26   :  { %674 = vsyncadd [#allocation6], 4294961152  ;;  %v681_v0 = vmov 0.0|0.0   ;;  %v682_v1 = vmov 0.0   ;;  %vm683_vm0 = vmmov 0   ;;  %v64_v2 = vld [vmem:[#allocation5 + $0x8] sm:$0xff] }
  0x27   :  { %556 = vmatprep.subr.bf16.mxu1 %v681_v0  ;;  %175 = vmatprep.mubr.f32.mxu0 %v682_v1  ;;  %v67_v3 = vld [vmem:[#allocation5 + $0x20] sm:$0xff]  ;;  %v66_v6 = vld [vmem:[#allocation5 + $0x18] sm:$0xff]  ;;  %v73_v8 = vld [vmem:[#allocation5 + $0x50] sm:$0xff]  ;;  %vm269_vm1 = vcmask 130048  }
  0x28   :  { %514 = vmatprep.mubr.msk.f32.mxu1 %vm683_vm0, %v682_v1  ;;  %v63_v4 = vld [vmem:[#allocation5] sm:$0xff]  ;;  %v524_v5 = vpack.c.bf16 %v67_v3, %v64_v2  ;;  %v70_v7 = vld [vmem:[#allocation5 + $0x38] sm:$0xff]  ;;  %v69_v11 = vld [vmem:[#allocation5 + $0x30] sm:$0xff] }
  0x29   :  { %v526_v9 = vpack.c.bf16 %v66_v6, %v63_v4  ;;  %v528_v10 = vpack.c.bf16 %v73_v8, %v70_v7  ;;  %v72_v12 = vld [vmem:[#allocation5 + $0x48] sm:$0xff]  ;;  %v79_v14 = vld [vmem:[#allocation5 + $0x80] sm:$0xff]  ;;  %v78_v18 = vld [vmem:[#allocation5 + $0x78] sm:$0xff] }
  0x2a   :  { %v76_v13 = vld [vmem:[#allocation5 + $0x68] sm:$0xff]  ;;  %525 = vmatprep.subr.bf16.mxu0 %v524_v5  ;;  %v530_v15 = vpack.c.bf16 %v72_v12, %v69_v11  ;;  %v75_v17 = vld [vmem:[#allocation5 + $0x60] sm:$0xff]  ;;  %v82_v19 = vld [vmem:[#allocation5 + $0x98] sm:$0xff] }
  0x2b   :  { %527 = vmatpush1.bf16.msra.mxu0 %v526_v9  ;;  %v532_v16 = vpack.c.bf16 %v79_v14, %v76_v13  ;;  %v85_v20 = vld [vmem:[#allocation5 + $0xb0] sm:$0xff]  ;;  %v534_v21 = vpack.c.bf16 %v78_v18, %v75_v17  ;;  %v68_v23 = vld [vmem:[#allocation5 + $0x28] sm:$0xff]  ;;  %v91_v29 = vld [vmem:[#allocation5 + $0xe0] sm:$0xff] }
  0x2c   :  { %529 = vmatprep.subr.bf16.mxu0 %v528_v10  ;;  %v65_v22 = vld [vmem:[#allocation5 + $0x10] sm:$0xff]  ;;  %v536_v24 = vpack.c.bf16 %v85_v20, %v82_v19  ;;  %v84_v26 = vld [vmem:[#allocation5 + $0xa8] sm:$0xff]  ;;  %v71_v30 = vld [vmem:[#allocation5 + $0x40] sm:$0xff] }
  0x2d   :  { %v81_v25 = vld [vmem:[#allocation5 + $0x90] sm:$0xff]  ;;  %v88_v27 = vld [vmem:[#allocation5 + $0xc8] sm:$0xff]  ;;  %v557_v28 = vpack.c.bf16 %v68_v23, %v65_v22  ;;  %v74_v31 = vld [vmem:[#allocation5 + $0x58] sm:$0xff]  ;;  %v254_v23 = vlaneseq }
  0x2e   :  { %v560_v32 = vpack.c.bf16 %v74_v31, %v71_v30  ;;  %v538_v33 = vpack.c.bf16 %v84_v26, %v81_v25  ;;  %v77_v34 = vld [vmem:[#allocation5 + $0x70] sm:$0xff]  ;;  %v80_v35 = vld [vmem:[#allocation5 + $0x88] sm:$0xff]  ;;  %v540_v36 = vpack.c.bf16 %v91_v29, %v88_v27  ;;  %v87_v37 = vld [vmem:[#allocation5 + $0xc0] sm:$0xff] }
  0x2f   :  { %531 = vmatpush1.bf16.msra.mxu0 %v530_v15  ;;  %558 = vmatpush3.bf16.msra.mxu1 %v557_v28  ;;  %v90_v38 = vld [vmem:[#allocation5 + $0xd8] sm:$0xff]  ;;  %v97_v40 = vld [vmem:[#allocation5 + $0x110] sm:$0xff]  ;;  %v563_v41 = vpack.c.bf16 %v80_v35, %v77_v34  ;;  %v83_v43 = vld [vmem:[#allocation5 + $0xa0] sm:$0xff] }
  0x30   :  { %533 = vmatprep.subr.bf16.mxu0 %v532_v16  ;;  %559 = vmatprep.subr.bf16.mxu1 %v681_v0  ;;  %v94_v39 = vld [vmem:[#allocation5 + $0xf8] sm:$0xff]  ;;  %v542_v42 = vpack.c.bf16 %v90_v38, %v87_v37  ;;  %v93_v46 = vld [vmem:[#allocation5 + $0xf0] sm:$0xff]  ;;  %v96_v47 = vld [vmem:[#allocation5 + $0x108] sm:$0xff] }
  0x31   :  { %v86_v44 = vld [vmem:[#allocation5 + $0xb8] sm:$0xff]  ;;  %v544_v45 = vpack.c.bf16 %v97_v40, %v94_v39  ;;  %v100_v48 = vld [vmem:[#allocation5 + $0x128] sm:$0xff]  ;;  %v103_v49 = vld [vmem:[#allocation5 + $0x140] sm:$0xff]  ;;  %v546_v51 = vpack.c.bf16 %v96_v47, %v93_v46 }
  0x32   :  { %v566_v50 = vpack.c.bf16 %v86_v44, %v83_v43  ;;  %v89_v52 = vld [vmem:[#allocation5 + $0xd0] sm:$0xff]  ;;  %v92_v53 = vld [vmem:[#allocation5 + $0xe8] sm:$0xff]  ;;  %v548_v54 = vpack.c.bf16 %v103_v49, %v100_v48  ;;  %v99_v55 = vld [vmem:[#allocation5 + $0x120] sm:$0xff] }
  0x33   :  { %535 = vmatpush1.bf16.msra.mxu0 %v534_v21  ;;  %561 = vmatpush3.bf16.msra.mxu1 %v560_v32  ;;  %v102_v56 = vld [vmem:[#allocation5 + $0x138] sm:$0xff]  ;;  %v109_v58 = vld [vmem:[#allocation5 + $0x170] sm:$0xff]  ;;  %v569_v59 = vpack.c.bf16 %v92_v53, %v89_v52  ;;  %v95_v61 = vld [vmem:[#allocation5 + $0x100] sm:$0xff] }
  0x34   :  { %537 = vmatprep.subr.bf16.mxu0 %v536_v24  ;;  %562 = vmatprep.subr.bf16.mxu1 %v681_v0  ;;  %v106_v57 = vld [vmem:[#allocation5 + $0x158] sm:$0xff]  ;;  %v550_v60 = vpack.c.bf16 %v102_v56, %v99_v55  ;;  %v105_v2 = vld [vmem:[#allocation5 + $0x150] sm:$0xff]  ;;  %v108_v3 = vld [vmem:[#allocation5 + $0x168] sm:$0xff]  ;;  %v255_v24 = vshrl.u32 %v254_v23, 7 }
  0x35   :  { %v98_v62 = vld [vmem:[#allocation5 + $0x118] sm:$0xff]  ;;  %v552_v63 = vpack.c.bf16 %v109_v58, %v106_v57  ;;  %v60_v5 = vld [vmem:[#allocation2 + $0x20] sm:$0xff]  ;;  %v554_v7 = vpack.c.bf16 %v108_v3, %v105_v2  ;;  %v104_v9 = vld [vmem:[#allocation5 + $0x148] sm:$0xff] }
  0x36   :  { %v57_v4 = vld [vmem:[#allocation2 + $0x8] sm:$0xff]  ;;  %v572_v6 = vpack.c.bf16 %v98_v62, %v95_v61  ;;  %v101_v8 = vld [vmem:[#allocation5 + $0x130] sm:$0xff]  ;;  %v59_v12 = vld [vmem:[#allocation2 + $0x18] sm:$0xff]  ;;  %v256_v25 = vsub.s32 0, %v255_v24  ;;  %v260_v34 = vsub.s32 1, %v255_v24  ;;  %v264_v35 = vsub.s32 2, %v255_v24 }
  0x37   :  { %539 = vmatpush1.bf16.msra.mxu0 %v538_v33  ;;  %564 = vmatpush3.bf16.msra.mxu1 %v563_v41  ;;  %v580_v10 = vpack.c.bf16 %v60_v5, %v57_v4  ;;  %v56_v11 = vld [vmem:[#allocation2] sm:$0xff]  ;;  %v575_v13 = vpack.c.bf16 %v104_v9, %v101_v8  ;;  %v107_v16 = vld [vmem:[#allocation5 + $0x160] sm:$0xff]  ;;  %v110_v17 = vld [vmem:[#allocation5 + $0x178] sm:$0xff] }
  0x38   :  { %541 = vmatprep.subr.bf16.mxu0 %v540_v36  ;;  %565 = vmatprep.subr.bf16.mxu1 %v681_v0  ;;  %v62_v14 = vld [vmem:[%s792_s1] sm:$0xff]  ;;  %v582_v15 = vpack.c.bf16 %v59_v12, %v56_v11  ;;  %v578_v18 = vpack.c.bf16 %v110_v17, %v107_v16  ;;  %v58_v19 = vld [vmem:[#allocation2 + $0x10] sm:$0xff]  ;;  %v61_v20 = vld [vmem:[#allocation2 + $0x28] sm:$0xff] }
  0x39   :  { %v585_v21 = vpack.c.bf16 %v61_v20, %v58_v19  ;;  %v55_v22 = vld [vmem:[%s791_s0] sm:$0xff] }
  0x3a   :  { %v252_v26 = vld [vmem:[%s796_s5] sm:$0x7] }
  0x3b   :  { %543 = vmatpush1.bf16.msra.mxu0 %v542_v42  ;;  %567 = vmatpush3.bf16.msra.mxu1 %v566_v50  ;;  %v257_v27 = vrot.slane %v252_v26, %v256_v25  ;;  %v265_v36 = vrot.slane %v252_v26, %v264_v35  ;;  %v461_v37 = vld [vmem:[%s797_s6] ss:$0 sm:$0xff]  ;;  %s684_s6 = smov [#allocation7]  }
  0x3c   :  { %545 = vmatprep.subr.bf16.mxu0 %v544_v45  ;;  %568 = vmatprep.subr.bf16.mxu1 %v681_v0  ;;  %v438_v50 = vld [vmem:[%s793_s2] sm:$0xff]  ;;  %s449_s9 = sshll.u32 %s684_s6, 4  ;;  %s450_s9 = int_to_ptr.vmem [resolvable:$true] %s449_s9 }
  0x3d   :  { %s649_s10 = scalar_lea.vmem %s450_s9, 128  ;;  %p654_p3 = scmp.lt.s32.totalorder %s450_s9, %s450_s9 }
  0x3e   :  { %p650_p2 = scmp.ne.s32.totalorder %s450_s9, %s649_s10  ;;  %p655_p4 = scmp.lt.s32.totalorder %s649_s10, %s649_s10 }
  0x3f   :  { %547 = vmatpush1.bf16.msra.mxu0 %v546_v51  ;;  %570 = vmatpush3.bf16.msra.mxu1 %v569_v59 }
  0x40   :  { %549 = vmatprep.subr.bf16.mxu0 %v548_v54  ;;  %571 = vmatprep.subr.bf16.mxu1 %v681_v0  ;;  %p656_p5 = por %p655_p4, %p654_p3 }
  0x42   :  { %p657_p6 = pnand %p656_p5, %p650_p2 }
  0x43   :  { %551 = vmatpush1.bf16.msra.mxu0 %v550_v60  ;;  %573 = vmatpush3.bf16.msra.mxu1 %v572_v6 }
  0x44   :  { %553 = vmatprep.subr.bf16.mxu0 %v552_v63  ;;  %574 = vmatprep.subr.bf16.mxu1 %v681_v0 }
  0x47   :  { %555 = vmatpush1.bf16.msra.mxu0 %v554_v7  ;;  %576 = vmatpush3.bf16.msra.mxu1 %v575_v13 }
  0x48   :  { %581 = vmatprep.subr.bf16.mxu0 %v580_v10  ;;  %577 = vmatprep.subr.bf16.mxu1 %v681_v0 }
  0x4a   :  { %176 = vmatmul.mubr.f32.vlgmr.msra.gmra.mrb[0].mxu0 %v62_v14 }
  0x4b   :  { %583 = vmatpush1.bf16.msra.mxu0 %v582_v15  ;;  %337 = vmatprep.mubr.f32.mxu0 %v682_v1 }
  0x4c   :  { %579 = vmatpush3.bf16.msra.mxu1 %v578_v18 }
  0x4d   :  { %584 = vmatprep.subr.bf16.mxu1 %v681_v0 }
  0x4f   :  { %515 = vmatmul.mubr.f32.vlgmr.msra.gmra.mrb[0].mxu1 %v62_v14 }
  0x50   :  { %586 = vmatpush3.bf16.msra.mxu1 %v585_v21  ;;  %521 = vmatprep.mubr.msk.f32.mxu1 %vm683_vm0, %v682_v1  ;;  %v261_v1 = vrot.slane %v252_v26, %v260_v34 }
  0x52   :  { %459 = vmatmul.mubr.msk.f32.vlgmr.msra.gmra.mrb[0].mxu0 %vm269_vm1, %v55_v22 }
  0x53   :  { %522 = vmatmul.mubr.msk.f32.vlgmr.msra.gmra.mrb[2].mxu1 %vm269_vm1, %v55_v22 }
 0x122   :  { %v248_v28 = vpop.f32.mrb[0].mxu1 }
 0x123   :  { %v516_v30 = vpop.f32.mrb[1].mxu1  ;;  %v431_v41 = vadd.f32 %v461_v37, %v248_v28 }
 0x125   :  { %v339_v29 = vpop.f32.mrb[0].mxu0 }
 0x126   :  { %v340_v31 = vadd.f32 %v339_v29, %v257_v27  ;;  %v341_v0 = vpop.f32.mrb[1].mxu0  ;;  %v410_v32 = vpop.f32.mrb[2].mxu1 }
 0x127   :  { %v523_v33 = vpop.f32.mrb[3].mxu1  ;;  %v342_v40 = vadd.f32 %v341_v0, %v261_v1  ;;  %v411_v42 = vadd.f32 %v410_v32, %v265_v36 }
 0x128   :  { %599 = vtanh.f32 %v340_v31  ;;  %vm416_vm2 = vcmp.gt.f32.partialorder %v340_v31, 0.0 }
 0x129   :  { %601 = vtanh.f32 %v342_v40  ;;  %vm421_vm4 = vcmp.gt.f32.partialorder %v342_v40, 0.0 }
 0x132   :  { %v600_v38 = vpop.eup %599 }
 0x133   :  { %v417_v39 = vmul.f32 0.25, %v600_v38  ;;  %v602_v46 = vpop.eup %601 }
 0x134   :  { %v422_v48 = vmul.f32 0.25, %v602_v46 }
 0x135   :  { %v418_v43 = vsel %vm416_vm2, %v600_v38, %v417_v39 }
 0x136   :  { %v432_v44 = vmul.f32 %v431_v41, %v418_v43  ;;  %v423_v53 = vsel %vm421_vm4, %v602_v46, %v422_v48 }
 0x138   :  { %v433_v45 = vadd.f32 %v432_v44, %v411_v42 }
 0x13a   :  { %603 = vtanh.f32 %v433_v45  ;;  %vm435_vm3 = vcmp.gt.f32.partialorder %v433_v45, 0.0 }
 0x144   :  { %v604_v47 = vpop.eup %603 }
 0x145   :  { %v436_v49 = vmul.f32 0.25, %v604_v47 }
 0x147   :  { %v437_v51 = vsel %vm435_vm3, %v604_v47, %v436_v49 }
 0x148   :  { %v439_v52 = vsub.f32 %v438_v50, %v437_v51 }
 0x14a   :  { %v440_v54 = vmul.f32 %v439_v52, %v423_v53 }
 0x14c   :  { %v441_v55 = vadd.f32 %v440_v54, %v437_v51 }
 0x14e   :  { %442 = vst [vmem:[#allocation7] sm:$0xff] %v441_v55 }
 0x14f   :  { %660 = shalt.err (!%p657_p6)
}
 0x150   :  { %s661_s12 = scalar_lea.hbm %s798_s7, 128 }
 0x151   :  { %p662_p7 = scmp.ne.s32.totalorder %s798_s7, %s661_s12  ;;  %p665_p8 = scmp.lt.u32.totalorder %s661_s12, %s798_s7 }
 0x153   :  { %p667_p9 = pnand %p665_p8, %p662_p7 }
 0x155   :  { %670 = shalt.err (!%p667_p9)
}
 0x156   :  { %452 = dma.vmem_to_hbm [thread:$0]  %s450_s9, 128, %s798_s7, [#allocation4]  }
 0x157   :  { %675 = dma.done.wait [#allocation4], 128  }
 0x158   :  { %676 = vsyncadd [#allocation4], 4294967168 }
 0x159   :  { %456 = vsyncpa [#allocation3], 1 }
 0x15a   :  { %457 = vsyncpa [#allocation6], 1 }
 0x15b   :  { %458 = vsyncpa [#allocation4], 1 }

</bundles_post_ra>
